<compile_context>
chip_gen: v5e
topology: v5e:2x2
jax: 0.10.0
libtpu: 0.0.40
codegen_flags: <defaults>
</compile_context>

<pallas_src>
import jax
import jax.numpy as jnp
from jax import lax
from jax.experimental import pallas as pl
from jax.experimental.pallas import tpu as pltpu


def _round_up(x, m):
    return -(-x // m) * m


def _make_mlp_sum_kernel(compute_dtype, true_b, tile_b, need_mask):
    """Kernel factory: compute dtype / padding mask are static (closed over)."""

    def kernel(x_ref, w1_ref, b1_ref, w2_ref, b2_ref, w3t_ref, out_ref):
        x = x_ref[...]                                   # (tile_b, D) f32 straight from HBM
        if compute_dtype != jnp.float32:
            x = x.astype(compute_dtype)                  # in-kernel cast: no extra HBM traffic

        h1 = jnp.dot(x, w1_ref[...], preferred_element_type=jnp.float32)   # MXU
        h1 = jnp.maximum(h1 + b1_ref[...], 0.0)                            # f32 bias+ReLU (VPU)
        if compute_dtype != jnp.float32:
            h1 = h1.astype(compute_dtype)                # fused cast; halves h1 footprint

        h2 = jnp.dot(h1, w2_ref[...], preferred_element_type=jnp.float32)  # MXU
        h2 = jnp.maximum(h2 + b2_ref[...], 0.0)                            # (tile_b, H) f32

        if need_mask:
            rows = (pl.program_id(0) * tile_b
                    + lax.broadcasted_iota(jnp.int32, h2.shape, 0))
            h2 = jnp.where(rows < true_b, h2, 0.0)       # zero out padded batch rows

        # Layer 3 + final sum without an MXU pass (bias b3 added in the wrapper):
        #   sum_i (h2[i,:] @ w3) == (sum_i h2[i,:]) . w3
        colsum = jnp.sum(h2, axis=0, keepdims=True)                        # (1, H)  XLU reduce
        partial = jnp.sum(colsum * w3t_ref[...], axis=-1, keepdims=True)   # (1, 1)  VPU + lane reduce

        # Broadcast into a lane-dense (1, 1, 128) block -> unmasked vst.
        out_ref[...] = jnp.broadcast_to(partial.reshape(1, 1, 1), out_ref.shape)

    return kernel


def _pick_tile_b(B, D, H):
    """Largest VMEM-friendly batch tile; >=2 tiles once B is large (v7x megacore)."""
    budget = 24 << 20                              # headroom under v7x's 64 MiB VMEM
    per_row = 2 * D * 4 + 2 * H * 4                # 2 f32 x-buffers + f32 h1/h2 per batch row
    ceiling = max(8, min(1024, (budget // per_row) // 8 * 8))
    if B <= 256:
        return B                                   # single grid step for small batches
    if B <= 2 * ceiling:
        return min(ceiling, _round_up(-(-B // 2), 8))   # two tiles -> both v7x TensorCores
    return ceiling                                 # amortize ~0.35 us/step overhead at large B


def net_forward(traj, params, *, tile_b=None, compute_dtype=jnp.float32):
    """Pallas implementation of Net.forward: sum(MLP(traj))."""
    w1, b1, w2, b2, w3, b3 = params
    B, D = traj.shape
    H = w1.shape[1]

    if tile_b is None:
        tile_b = _pick_tile_b(B, D, H)
    if tile_b >= B:
        tile_b = B                                 # full-dim block is always legal
    else:
        tile_b = _round_up(tile_b, 8)              # sublane alignment for partial tiles

    num_tiles = -(-B // tile_b)
    b_pad = num_tiles * tile_b

    x = traj.astype(jnp.float32)
    if b_pad != B:
        x = jnp.pad(x, ((0, b_pad - B), (0, 0)))   # padded rows masked in-kernel

    # Weights cast once in the wrapper (constant index maps -> fetched once);
    # activations stay f32 in HBM and are cast inside the kernel.
    w1c = w1.astype(compute_dtype)
    w2c = w2.astype(compute_dtype)
    w3t = w3.reshape(1, H).astype(jnp.float32)     # layer-3 fold is an f32 VPU row op

    kernel = _make_mlp_sum_kernel(compute_dtype, B, tile_b, b_pad != B)

    # Rough per-step VMEM estimate (double-buffered inputs + f32 temporaries).
    w_bytes = jnp.dtype(compute_dtype).itemsize
    vmem_est = (2 * tile_b * D * 4                 # x tile, double-buffered, f32
                + 2 * (D * H + H * H) * w_bytes    # W1 + W2, double-buffered
                + 2 * 3 * H * 4                    # b1, b2, w3t
                + 2 * tile_b * H * 4               # h1 / h2 temporaries
                + 2 * 128 * 4)                     # output block
    cp_kwargs = dict(dimension_semantics=("parallel",))
    if vmem_est > (30 << 20):
        cp_kwargs["vmem_limit_bytes"] = min(int(vmem_est * 3 // 2), 60 << 20)

    partials = pl.pallas_call(
        kernel,
        out_shape=jax.ShapeDtypeStruct((num_tiles, 1, 128), jnp.float32),
        grid_spec=pltpu.PrefetchScalarGridSpec(
            num_scalar_prefetch=0,
            grid=(num_tiles,),
            in_specs=[
                pl.BlockSpec((tile_b, D), lambda i: (i, 0)),   # traj tile (f32)
                pl.BlockSpec((D, H), lambda i: (0, 0)),        # W1 (constant index -> fetched once)
                pl.BlockSpec((1, H), lambda i: (0, 0)),        # b1
                pl.BlockSpec((H, H), lambda i: (0, 0)),        # W2
                pl.BlockSpec((1, H), lambda i: (0, 0)),        # b2
                pl.BlockSpec((1, H), lambda i: (0, 0)),        # W3 row (pre-transposed)
            ],
            out_specs=pl.BlockSpec((1, 1, 128), lambda i: (i, 0, 0)),  # per-tile partial sums
        ),
        compiler_params=pltpu.CompilerParams(**cp_kwargs),
    )(x, w1c, b1, w2c, b2, w3t)

    # b3 is added once per row -> B * b3 in total.
    return jnp.sum(partials[:, 0, 0]) + B * b3[0, 0]


def init_params(key, input_dim, hidden=256):
    """Deterministic init mimicking PyTorch nn.Linear default (U[-1/sqrt(fan_in), 1/sqrt(fan_in)])."""
    ks = jax.random.split(key, 6)

    def lin(kw, kb, fan_in, fan_out):
        bound = 1.0 / jnp.sqrt(fan_in)
        w = jax.random.uniform(kw, (fan_in, fan_out), jnp.float32, -bound, bound)
        b = jax.random.uniform(kb, (1, fan_out), jnp.float32, -bound, bound)
        return w, b

    w1, b1 = lin(ks[0], ks[1], input_dim, hidden)
    w2, b2 = lin(ks[2], ks[3], hidden, hidden)
    w3, b3 = lin(ks[4], ks[5], hidden, 1)
    return (w1, b1, w2, b2, w3, b3)


def net_forward_ref(traj, params):
    w1, b1, w2, b2, w3, b3 = params
    h1 = jnp.maximum(traj @ w1 + b1, 0.0)
    h2 = jnp.maximum(h1 @ w2 + b2, 0.0)
    r = h2 @ w3 + b3
    return jnp.sum(r)


if __name__ == "__main__":
    key = jax.random.PRNGKey(0)
    k_x, k_p, k_x2 = jax.random.split(key, 3)

    B, input_dim = 16, 32
    traj = jax.random.normal(k_x, (B, input_dim), jnp.float32)
    params = init_params(k_p, input_dim)

    # f32 path: exact semantics of the PyTorch module.
    ref = net_forward_ref(traj, params)
    out = jax.block_until_ready(net_forward(traj, params))
    assert jnp.allclose(out, ref, rtol=1e-5, atol=1e-5), (out, ref)

    # bf16 matmul-operand path (bf16-native MXU on v5e/v6e/v7x, f32 accumulate/epilogue).
    out_bf16 = jax.block_until_ready(
        net_forward(traj, params, compute_dtype=jnp.bfloat16))
    assert jnp.allclose(out_bf16, ref, rtol=5e-2, atol=1e-1), (out_bf16, ref)

    # Multi-tile + non-divisible batch path (num_tiles > 1, padded rows masked in-kernel).
    B2 = 300
    traj2 = jax.random.normal(k_x2, (B2, input_dim), jnp.float32)
    ref2 = net_forward_ref(traj2, params)
    out2 = jax.block_until_ready(net_forward(traj2, params))
    assert jnp.allclose(out2, ref2, rtol=1e-4, atol=1e-2), (out2, ref2)

    print("KERNEL_OK")
</pallas_src>

<mosaic_0001>
module attributes {stable_mosaic.version = 11 : i64} {
  func.func @kernel(%arg0: i32, %arg1: memref<16x32xf32, #tpu.memory_space<vmem>>, %arg2: memref<32x256xf32, #tpu.memory_space<vmem>>, %arg3: memref<1x256xf32, #tpu.memory_space<vmem>>, %arg4: memref<256x256xf32, #tpu.memory_space<vmem>>, %arg5: memref<1x256xf32, #tpu.memory_space<vmem>>, %arg6: memref<1x256xf32, #tpu.memory_space<vmem>>, %arg7: memref<1x1x128xf32, #tpu.memory_space<vmem>>) attributes {dimension_semantics = [#tpu.dimension_semantics<parallel>], iteration_bounds = array<i64: 1>, scalar_prefetch = 0 : i64, scratch_operands = 0 : i64, tpu.core_type = #tpu.core_type<tc>, window_params = [{transform_indices = @transform_0, window_bounds = array<i64: 16, 32>}, {pipeline_mode = #tpu.pipeline_mode<synchronous>, transform_indices = @transform_1, window_bounds = array<i64: 32, 256>}, {pipeline_mode = #tpu.pipeline_mode<synchronous>, transform_indices = @transform_2, window_bounds = array<i64: 1, 256>}, {pipeline_mode = #tpu.pipeline_mode<synchronous>, transform_indices = @transform_3, window_bounds = array<i64: 256, 256>}, {pipeline_mode = #tpu.pipeline_mode<synchronous>, transform_indices = @transform_4, window_bounds = array<i64: 1, 256>}, {pipeline_mode = #tpu.pipeline_mode<synchronous>, transform_indices = @transform_5, window_bounds = array<i64: 1, 256>}, {transform_indices = @transform_6, window_bounds = array<i64: 1, 1, 128>}]} {
    %c0 = arith.constant 0 : index
    %c0_0 = arith.constant 0 : index
    %0 = vector.load %arg1[%c0, %c0_0] : memref<16x32xf32, #tpu.memory_space<vmem>>, vector<16x32xf32>
    %c0_1 = arith.constant 0 : index
    %c0_2 = arith.constant 0 : index
    %1 = vector.load %arg2[%c0_1, %c0_2] : memref<32x256xf32, #tpu.memory_space<vmem>>, vector<32x256xf32>
    %cst = arith.constant dense<0.000000e+00> : vector<16x256xf32>
    %2 = tpu.matmul %0, %1, %cst {dimension_numbers = #tpu.dot_dimension_numbers<[1], [0], [0], [1], [0, 0, 1, 1], [], []>} : vector<16x32xf32>, vector<32x256xf32>, vector<16x256xf32> -> vector<16x256xf32>
    %c0_3 = arith.constant 0 : index
    %c0_4 = arith.constant 0 : index
    %3 = vector.load %arg3[%c0_3, %c0_4] : memref<1x256xf32, #tpu.memory_space<vmem>>, vector<1x256xf32>
    %4 = vector.broadcast %3 : vector<1x256xf32> to vector<16x256xf32>
    %5 = arith.addf %2, %4 : vector<16x256xf32>
    %cst_5 = arith.constant 0.000000e+00 : f32
    %6 = vector.broadcast %cst_5 : f32 to vector<16x256xf32>
    %7 = arith.maximumf %5, %6 : vector<16x256xf32>
    %c0_6 = arith.constant 0 : index
    %c0_7 = arith.constant 0 : index
    %8 = vector.load %arg4[%c0_6, %c0_7] : memref<256x256xf32, #tpu.memory_space<vmem>>, vector<256x256xf32>
    %cst_8 = arith.constant dense<0.000000e+00> : vector<16x256xf32>
    %9 = tpu.matmul %7, %8, %cst_8 {dimension_numbers = #tpu.dot_dimension_numbers<[1], [0], [0], [1], [0, 0, 1, 1], [], []>} : vector<16x256xf32>, vector<256x256xf32>, vector<16x256xf32> -> vector<16x256xf32>
    %c0_9 = arith.constant 0 : index
    %c0_10 = arith.constant 0 : index
    %10 = vector.load %arg5[%c0_9, %c0_10] : memref<1x256xf32, #tpu.memory_space<vmem>>, vector<1x256xf32>
    %11 = vector.broadcast %10 : vector<1x256xf32> to vector<16x256xf32>
    %12 = arith.addf %9, %11 : vector<16x256xf32>
    %cst_11 = arith.constant 0.000000e+00 : f32
    %13 = vector.broadcast %cst_11 : f32 to vector<16x256xf32>
    %14 = arith.maximumf %12, %13 : vector<16x256xf32>
    %cst_12 = arith.constant dense<0.000000e+00> : vector<256xf32>
    %15 = vector.multi_reduction <add>, %14, %cst_12 [0] : vector<16x256xf32> to vector<256xf32>
    %16 = vector.shape_cast %15 : vector<256xf32> to vector<1x256xf32>
    %c0_13 = arith.constant 0 : index
    %c0_14 = arith.constant 0 : index
    %17 = vector.load %arg6[%c0_13, %c0_14] : memref<1x256xf32, #tpu.memory_space<vmem>>, vector<1x256xf32>
    %18 = arith.mulf %16, %17 : vector<1x256xf32>
    %cst_15 = arith.constant dense<0.000000e+00> : vector<1xf32>
    %19 = vector.multi_reduction <add>, %18, %cst_15 [1] : vector<1x256xf32> to vector<1xf32>
    %20 = vector.shape_cast %19 : vector<1xf32> to vector<1x1xf32>
    %21 = vector.shape_cast %20 : vector<1x1xf32> to vector<1x1x1xf32>
    %22 = vector.shape_cast %21 : vector<1x1x1xf32> to vector<1x1x1xf32>
    %23 = vector.broadcast %22 : vector<1x1x1xf32> to vector<1x1x128xf32>
    %c0_16 = arith.constant 0 : index
    %c0_17 = arith.constant 0 : index
    %c0_18 = arith.constant 0 : index
    %24 = vector.load %arg7[%c0_16, %c0_17, %c0_18] : memref<1x1x128xf32, #tpu.memory_space<vmem>>, vector<1x1x128xf32>
    tpu.vector_store %arg7[%c0_16, %c0_17, %c0_18], %23 {strides = array<i32>} : memref<1x1x128xf32, #tpu.memory_space<vmem>>, vector<1x1x128xf32>,
    return
  }
  func.func @transform_0(%arg0: i32) -> (i32, i32) {
    %c0_i32 = arith.constant 0 : i32
    %c0_i32_0 = arith.constant 0 : i32
    return %arg0, %c0_i32 : i32, i32
  }
  func.func @transform_1(%arg0: i32) -> (i32, i32) {
    %c0_i32 = arith.constant 0 : i32
    %c0_i32_0 = arith.constant 0 : i32
    %c0_i32_1 = arith.constant 0 : i32
    return %c0_i32, %c0_i32_0 : i32, i32
  }
  func.func @transform_2(%arg0: i32) -> (i32, i32) {
    %c0_i32 = arith.constant 0 : i32
    %c0_i32_0 = arith.constant 0 : i32
    %c0_i32_1 = arith.constant 0 : i32
    return %c0_i32, %c0_i32_0 : i32, i32
  }
  func.func @transform_3(%arg0: i32) -> (i32, i32) {
    %c0_i32 = arith.constant 0 : i32
    %c0_i32_0 = arith.constant 0 : i32
    %c0_i32_1 = arith.constant 0 : i32
    return %c0_i32, %c0_i32_0 : i32, i32
  }
  func.func @transform_4(%arg0: i32) -> (i32, i32) {
    %c0_i32 = arith.constant 0 : i32
    %c0_i32_0 = arith.constant 0 : i32
    %c0_i32_1 = arith.constant 0 : i32
    return %c0_i32, %c0_i32_0 : i32, i32
  }
  func.func @transform_5(%arg0: i32) -> (i32, i32) {
    %c0_i32 = arith.constant 0 : i32
    %c0_i32_0 = arith.constant 0 : i32
    %c0_i32_1 = arith.constant 0 : i32
    return %c0_i32, %c0_i32_0 : i32, i32
  }
  func.func @transform_6(%arg0: i32) -> (i32, i32, i32) {
    %c0_i32 = arith.constant 0 : i32
    %c0_i32_0 = arith.constant 0 : i32
    %c0_i32_1 = arith.constant 0 : i32
    return %arg0, %c0_i32, %c0_i32_0 : i32, i32, i32
  }
}

</mosaic_0001>

<bundles_post_ra>
// kernel: tpu_custom_call.1
= control target key start
LH: loop header
LB: loop body
LE: loop exit
PB: predicated region body
PF: predicated region fallthrough
CT: control target
= control target key end

     0   :  { %11 = vsyncpa [#allocation3], 0  ;;  %s582_s0 = inlined_call_operand.hbm [shape: f32[16,32], index: 0, kind: input, shape index: {}]   ;;  %s583_s1 = inlined_call_operand.hbm [shape: f32[32,256], index: 1, kind: input, shape index: {}]   ;;  %s584_s2 = inlined_call_operand.hbm [shape: f32[1,256], index: 2, kind: input, shape index: {}]   ;;  %s585_s3 = inlined_call_operand.hbm [shape: f32[256,256], index: 3, kind: input, shape index: {}]   ;;  %s586_s4 = inlined_call_operand.vmem [shape: f32[1,256], index: 4, kind: input, shape index: {}]   ;;  %s587_s5 = inlined_call_operand.vmem [shape: f32[1,256], index: 5, kind: input, shape index: {}]   ;;  %s588_s6 = inlined_call_operand.hbm [shape: f32[1,1,128], index: 6, kind: output, shape index: {}]  }
   0x1   :  { %12 = vsyncpa [#allocation6], 0 }
   0x2   :  { %13 = vsyncpa [#allocation9], 0  ;;  %s32_s23 = sshll.u32 %s583_s1, 4  ;;  %s33_s23 = int_to_ptr.hbm [resolvable:$true] %s32_s23 }
   0x3   :  { %14 = vsyncpa [#allocation4], 0  ;;  %s513_s24 = smov [#allocation5]   ;;  %s19_s28 = sshll.u32 %s582_s0, 4  ;;  %s20_s28 = int_to_ptr.hbm [resolvable:$true] %s19_s28 }
   0x4   :  { %s34_s25 = sshll.u32 %s513_s24, 4  ;;  %s514_s29 = smov 256   ;;  %s35_s25 = int_to_ptr.vmem [resolvable:$true] %s34_s25 }
   0x5   :  { %s515_s30 = smov 16   ;;  %s516_s7 = smov [#allocation2]  }
   0x6   :  { %40 = dma.hbm_to_vmem [thread:$0]  %s33_s23, 1024, %s35_s25, [#allocation6], %s514_s29, %s514_s29, %s515_s30  }
   0x7   :  { %s21_s8 = sshll.u32 %s516_s7, 4  ;;  %s517_s9 = smov 128   ;;  %s22_s8 = int_to_ptr.vmem [resolvable:$true] %s21_s8 }
   0x8   :  { %s518_s10 = smov 8   ;;  %s46_s12 = sshll.u32 %s584_s2, 4  ;;  %s47_s12 = int_to_ptr.hbm [resolvable:$true] %s46_s12 }
   0x9   :  { %27 = dma.hbm_to_vmem [thread:$0]  %s20_s28, 256, %s22_s8, [#allocation3], %s517_s9, %s517_s9, %s518_s10  }
   0xa   :  { %s519_s13 = smov [#allocation7]   ;;  %s56_s16 = sshll.u32 %s585_s3, 4  ;;  %s57_s16 = int_to_ptr.hbm [resolvable:$true] %s56_s16 }
   0xb   :  { %s48_s14 = sshll.u32 %s519_s13, 4  ;;  %s520_s17 = smov [#allocation8]   ;;  %s49_s14 = int_to_ptr.vmem [resolvable:$true] %s48_s14 }
   0xc   :  { %51 = dma.hbm_to_vmem [thread:$0]  %s47_s12, 32, %s49_s14, [#allocation6]  }
   0xd   :  { %s58_s18 = sshll.u32 %s520_s17, 4  ;;  %s59_s18 = int_to_ptr.vmem [resolvable:$true] %s58_s18 }
   0xe   :  { %64 = dma.hbm_to_vmem [thread:$0]  %s57_s16, 8192, %s59_s18, [#allocation9], %s514_s29, %s514_s29, %s515_s30  }
   0xf   :  { %505 = dma.done.wait [#allocation3], 256  }
  0x10   :  { %506 = vsyncadd [#allocation3], 4294967040 }
  0x11   :  { %507 = dma.done.wait [#allocation6], 1056  }
  0x12   :  { %508 = vsyncadd [#allocation6], 4294966240 }
  0x13   :  { %509 = dma.done.wait [#allocation9], 8192  }
  0x14   :  { %510 = vsyncadd [#allocation9], 4294959104  ;;  %v93_v0 = vld [vmem:[#allocation5 + $0x30] sm:$0xff]  ;;  %v91_v1 = vld [vmem:[#allocation5 + $0x20] sm:$0xff]  ;;  %vm101_vm0 = vcmask 261120   ;;  %vm346_vm1 = vcmask 1040384  }
  0x15   :  { %v94_v2 = vld [vmem:[#allocation5 + $0x38] sm:$0xff]  ;;  %120 = vmatpush.msra.mxu0 %v93_v0  ;;  %v92_v3 = vld [vmem:[#allocation5 + $0x28] sm:$0xff]  ;;  %v89_v4 = vld [vmem:[#allocation5 + $0x10] sm:$0xff]  ;;  %s521_s20 = smov [#allocation10]  }
  0x16   :  { %143 = vmatpush.msra.mxu1 %v94_v2  ;;  %v90_v5 = vld [vmem:[#allocation5 + $0x18] sm:$0xff]  ;;  %v87_v6 = vld [vmem:[#allocation5] sm:$0xff]  ;;  %v88_v8 = vld [vmem:[#allocation5 + $0x8] sm:$0xff]  ;;  %s358_s21 = sshll.u32 %s521_s20, 4  ;;  %s359_s21 = int_to_ptr.vmem [resolvable:$true] %s358_s21 }
  0x17   :  { %121 = vmatpush.msra.mxu0 %v91_v1  ;;  %v188_v7 = vld [vmem:[#allocation8 + $0xf0] sm:$0xff]  ;;  %v186_v9 = vld [vmem:[#allocation8 + $0xe0] sm:$0xff]  ;;  %v189_v12 = vld [vmem:[#allocation8 + $0xf8] sm:$0xff] }
  0x18   :  { %144 = vmatpush.msra.mxu1 %v92_v3  ;;  %228 = vmatpush.msra.mxu2 %v188_v7  ;;  %v220_v10 = vld [vmem:[#allocation8 + $0x1f0] sm:$0xff]  ;;  %v221_v13 = vld [vmem:[#allocation8 + $0x1f8] sm:$0xff]  ;;  %v218_v15 = vld [vmem:[#allocation8 + $0x1e0] sm:$0xff] }
  0x19   :  { %122 = vmatpush.msra.mxu0 %v89_v4  ;;  %v85_v11 = vld [vmem:[#allocation2] sm:$0xff]  ;;  %251 = vmatpush.msra.mxu3 %v220_v10  ;;  %v182_v18 = vld [vmem:[#allocation8 + $0xc0] sm:$0xff]  ;;  %v185_v20 = vld [vmem:[#allocation8 + $0xd8] sm:$0xff] }
  0x1a   :  { %145 = vmatpush.msra.mxu1 %v90_v5  ;;  %229 = vmatpush.msra.mxu2 %v186_v9  ;;  %v184_v14 = vld [vmem:[#allocation8 + $0xd0] sm:$0xff]  ;;  %v187_v16 = vld [vmem:[#allocation8 + $0xe8] sm:$0xff]  ;;  %v217_v21 = vld [vmem:[#allocation8 + $0x1d8] sm:$0xff] }
  0x1b   :  { %123 = vmatpush.msra.mxu0 %v87_v6  ;;  %v219_v17 = vld [vmem:[#allocation8 + $0x1e8] sm:$0xff]  ;;  %v216_v19 = vld [vmem:[#allocation8 + $0x1d0] sm:$0xff]  ;;  %252 = vmatpush.msra.mxu3 %v218_v15  ;;  %v214_v23 = vld [vmem:[#allocation8 + $0x1c0] sm:$0xff] }
  0x1c   :  { %146 = vmatpush.msra.mxu1 %v88_v8  ;;  %372 = vmatmul.msk.f32.vlgmr.msra.gmra.mxu0 %vm101_vm0, %v85_v11  ;;  %v180_v22 = vld [vmem:[#allocation8 + $0xb0] sm:$0xff]  ;;  %v183_v24 = vld [vmem:[#allocation8 + $0xc8] sm:$0xff]  ;;  %v181_v27 = vld [vmem:[#allocation8 + $0xb8] sm:$0xff] }
  0x1d   :  { %374 = vmatmul.msk.f32.vlgmr.msra.gmra.mxu1 %vm101_vm0, %v85_v11  ;;  %274 = vmatpush.msrb.mxu0 %v189_v12  ;;  %v215_v25 = vld [vmem:[#allocation8 + $0x1c8] sm:$0xff]  ;;  %v86_v26 = vld [vmem:[#allocation2 + $0x8] sm:$0xff]  ;;  %v178_v28 = vld [vmem:[#allocation8 + $0xa0] sm:$0xff] }
  0x1e   :  { %297 = vmatpush.msrb.mxu1 %v221_v13  ;;  %230 = vmatpush.msra.mxu2 %v184_v14  ;;  %v212_v29 = vld [vmem:[#allocation8 + $0x1b0] sm:$0xff]  ;;  %v213_v30 = vld [vmem:[#allocation8 + $0x1b8] sm:$0xff]  ;;  %v179_v31 = vld [vmem:[#allocation8 + $0xa8] sm:$0xff] }
  0x1f   :  { %275 = vmatpush.msrb.mxu0 %v187_v16  ;;  %253 = vmatpush.msra.mxu3 %v216_v19  ;;  %v176_v32 = vld [vmem:[#allocation8 + $0x90] sm:$0xff]  ;;  %v210_v33 = vld [vmem:[#allocation8 + $0x1a0] sm:$0xff]  ;;  %v211_v34 = vld [vmem:[#allocation8 + $0x1a8] sm:$0xff] }
  0x20   :  { %298 = vmatpush.msrb.mxu1 %v219_v17  ;;  %231 = vmatpush.msra.mxu2 %v182_v18  ;;  %v177_v35 = vld [vmem:[#allocation8 + $0x98] sm:$0xff]  ;;  %v174_v36 = vld [vmem:[#allocation8 + $0x80] sm:$0xff]  ;;  %v208_v37 = vld [vmem:[#allocation8 + $0x190] sm:$0xff] }
  0x21   :  { %276 = vmatpush.msrb.mxu0 %v185_v20  ;;  %254 = vmatpush.msra.mxu3 %v214_v23  ;;  %v209_v38 = vld [vmem:[#allocation8 + $0x198] sm:$0xff]  ;;  %v175_v39 = vld [vmem:[#allocation8 + $0x88] sm:$0xff]  ;;  %v172_v40 = vld [vmem:[#allocation8 + $0x70] sm:$0xff] }
  0x22   :  { %299 = vmatpush.msrb.mxu1 %v217_v21  ;;  %232 = vmatpush.msra.mxu2 %v180_v22  ;;  %v206_v41 = vld [vmem:[#allocation8 + $0x180] sm:$0xff]  ;;  %v207_v42 = vld [vmem:[#allocation8 + $0x188] sm:$0xff]  ;;  %v173_v43 = vld [vmem:[#allocation8 + $0x78] sm:$0xff] }
  0x23   :  { %277 = vmatpush.msrb.mxu0 %v183_v24  ;;  %255 = vmatpush.msra.mxu3 %v212_v29  ;;  %v170_v44 = vld [vmem:[#allocation8 + $0x60] sm:$0xff]  ;;  %v204_v45 = vld [vmem:[#allocation8 + $0x170] sm:$0xff]  ;;  %v205_v46 = vld [vmem:[#allocation8 + $0x178] sm:$0xff] }
  0x24   :  { %300 = vmatpush.msrb.mxu1 %v215_v25  ;;  %373 = vmatmul.msk.f32.gmra.mxu0 %vm101_vm0, %v86_v26  ;;  %v171_v47 = vld [vmem:[#allocation8 + $0x68] sm:$0xff]  ;;  %v168_v48 = vld [vmem:[#allocation8 + $0x50] sm:$0xff]  ;;  %v202_v49 = vld [vmem:[#allocation8 + $0x160] sm:$0xff] }
  0x25   :  { %375 = vmatmul.msk.f32.gmra.mxu1 %vm101_vm0, %v86_v26  ;;  %278 = vmatpush.msrb.mxu0 %v181_v27  ;;  %v203_v50 = vld [vmem:[#allocation8 + $0x168] sm:$0xff]  ;;  %v169_v51 = vld [vmem:[#allocation8 + $0x58] sm:$0xff]  ;;  %v166_v52 = vld [vmem:[#allocation8 + $0x40] sm:$0xff] }
  0x26   :  { %233 = vmatpush.msra.mxu2 %v178_v28  ;;  %301 = vmatpush.msrb.mxu1 %v213_v30  ;;  %v200_v53 = vld [vmem:[#allocation8 + $0x150] sm:$0xff]  ;;  %v201_v54 = vld [vmem:[#allocation8 + $0x158] sm:$0xff]  ;;  %v167_v55 = vld [vmem:[#allocation8 + $0x48] sm:$0xff] }
  0x27   :  { %279 = vmatpush.msrb.mxu0 %v179_v31  ;;  %256 = vmatpush.msra.mxu3 %v210_v33  ;;  %v164_v56 = vld [vmem:[#allocation8 + $0x30] sm:$0xff]  ;;  %v198_v57 = vld [vmem:[#allocation8 + $0x140] sm:$0xff]  ;;  %v199_v58 = vld [vmem:[#allocation8 + $0x148] sm:$0xff] }
  0x28   :  { %234 = vmatpush.msra.mxu2 %v176_v32  ;;  %302 = vmatpush.msrb.mxu1 %v211_v34  ;;  %v165_v59 = vld [vmem:[#allocation8 + $0x38] sm:$0xff]  ;;  %v162_v60 = vld [vmem:[#allocation8 + $0x20] sm:$0xff]  ;;  %v196_v61 = vld [vmem:[#allocation8 + $0x130] sm:$0xff] }
  0x29   :  { %280 = vmatpush.msrb.mxu0 %v177_v35  ;;  %257 = vmatpush.msra.mxu3 %v208_v37  ;;  %v163_v62 = vld [vmem:[#allocation8 + $0x28] sm:$0xff]  ;;  %v197_v63 = vld [vmem:[#allocation8 + $0x138] sm:$0xff]  ;;  %v160_v0 = vld [vmem:[#allocation8 + $0x10] sm:$0xff] }
  0x2a   :  { %235 = vmatpush.msra.mxu2 %v174_v36  ;;  %303 = vmatpush.msrb.mxu1 %v209_v38  ;;  %v194_v1 = vld [vmem:[#allocation8 + $0x120] sm:$0xff]  ;;  %v161_v2 = vld [vmem:[#allocation8 + $0x18] sm:$0xff]  ;;  %v195_v3 = vld [vmem:[#allocation8 + $0x128] sm:$0xff] }
  0x2b   :  { %281 = vmatpush.msrb.mxu0 %v175_v39  ;;  %258 = vmatpush.msra.mxu3 %v206_v41  ;;  %v158_v4 = vld [vmem:[#allocation8] sm:$0xff]  ;;  %v192_v5 = vld [vmem:[#allocation8 + $0x110] sm:$0xff]  ;;  %v159_v6 = vld [vmem:[#allocation8 + $0x8] sm:$0xff] }
  0x2c   :  { %236 = vmatpush.msra.mxu2 %v172_v40  ;;  %304 = vmatpush.msrb.mxu1 %v207_v42  ;;  %v193_v7 = vld [vmem:[#allocation8 + $0x118] sm:$0xff]  ;;  %v190_v8 = vld [vmem:[#allocation8 + $0x100] sm:$0xff]  ;;  %v191_v9 = vld [vmem:[#allocation8 + $0x108] sm:$0xff] }
  0x2d   :  { %282 = vmatpush.msrb.mxu0 %v173_v43  ;;  %259 = vmatpush.msra.mxu3 %v204_v45  ;;  %v95_v10 = vld [vmem:[#allocation7] sm:$0x3]  ;;  %v222_v25 = vld [vmem:[%s586_s4] sm:$0x3] }
  0x2e   :  { %237 = vmatpush.msra.mxu2 %v170_v44  ;;  %305 = vmatpush.msrb.mxu1 %v205_v46  ;;  %v97_v11 = vperm.slane %v95_v10, 0  ;;  %v98_v12 = vperm.slane %v95_v10, 1  ;;  %v225_v27 = vperm.slane %v222_v25, 1  ;;  %v224_v31 = vperm.slane %v222_v25, 0 }
  0x2f   :  { %283 = vmatpush.msrb.mxu0 %v171_v47  ;;  %260 = vmatpush.msra.mxu3 %v202_v49 }
  0x30   :  { %238 = vmatpush.msra.mxu2 %v168_v48  ;;  %306 = vmatpush.msrb.mxu1 %v203_v50 }
  0x31   :  { %284 = vmatpush.msrb.mxu0 %v169_v51  ;;  %261 = vmatpush.msra.mxu3 %v200_v53 }
  0x32   :  { %239 = vmatpush.msra.mxu2 %v166_v52  ;;  %307 = vmatpush.msrb.mxu1 %v201_v54 }
  0x33   :  { %285 = vmatpush.msrb.mxu0 %v167_v55  ;;  %262 = vmatpush.msra.mxu3 %v198_v57  ;;  %v338_v57 = vld [vmem:[%s587_s5] sm:$0x3]  ;;  %s360_s5 = sshll.u32 %s588_s6, 4  ;;  %s361_s5 = int_to_ptr.hbm [resolvable:$true] %s360_s5 }
  0x34   :  { %240 = vmatpush.msra.mxu2 %v164_v56  ;;  %308 = vmatpush.msrb.mxu1 %v199_v58 }
  0x35   :  { %286 = vmatpush.msrb.mxu0 %v165_v59  ;;  %263 = vmatpush.msra.mxu3 %v196_v61  ;;  %v341_v61 = vperm.slane %v338_v57, 1 }
  0x36   :  { %241 = vmatpush.msra.mxu2 %v162_v60  ;;  %309 = vmatpush.msrb.mxu1 %v197_v63  ;;  %v340_v63 = vperm.slane %v338_v57, 0 }
  0x37   :  { %287 = vmatpush.msrb.mxu0 %v163_v62  ;;  %264 = vmatpush.msra.mxu3 %v194_v1 }
  0x38   :  { %242 = vmatpush.msra.mxu2 %v160_v0  ;;  %310 = vmatpush.msrb.mxu1 %v195_v3 }
  0x39   :  { %288 = vmatpush.msrb.mxu0 %v161_v2  ;;  %265 = vmatpush.msra.mxu3 %v192_v5 }
  0x3a   :  { %243 = vmatpush.msra.mxu2 %v158_v4  ;;  %311 = vmatpush.msrb.mxu1 %v193_v7 }
  0x3b   :  { %289 = vmatpush.msrb.mxu0 %v159_v6  ;;  %266 = vmatpush.msra.mxu3 %v190_v8 }
  0x3c   :  { %312 = vmatpush.msrb.mxu1 %v191_v9 }
  0x99   :  { %v125_v13 = vpop.f32.mrf.mxu0 }
  0x9a   :  { %v148_v14 = vpop.f32.mrf.mxu1  ;;  %v126_v15 = vadd.f32 %v125_v13, %v97_v11 }
  0x9b   :  { %v149_v16 = vadd.f32 %v148_v14, %v98_v12 }
  0x9c   :  { %v154_v17 = vmax.f32 %v126_v15, 0.0 }
  0x9d   :  { %v155_v18 = vmax.f32 %v149_v16, 0.0 }
  0x9e   :  { %244 = vmatmul.f32.vlgmr.msra.gmra.mxu2 %v154_v17  ;;  %290 = vmatmul.f32.vlgmr.msrb.gmra.mxu0 %v154_v17 }
  0x9f   :  { %267 = vmatmul.f32.vlgmr.msra.gmra.mxu3 %v155_v18  ;;  %313 = vmatmul.f32.vlgmr.msrb.gmra.mxu1 %v155_v18 }
  0xa1   :  { %v128_v19 = vpop.f32.mrf.mxu0 }
  0xa2   :  { %v151_v20 = vpop.f32.mrf.mxu1  ;;  %v129_v21 = vadd.f32 %v128_v19, %v97_v11 }
  0xa3   :  { %v152_v22 = vadd.f32 %v151_v20, %v98_v12 }
  0xa4   :  { %v156_v23 = vmax.f32 %v129_v21, 0.0 }
  0xa5   :  { %v157_v24 = vmax.f32 %v152_v22, 0.0 }
  0xa6   :  { %247 = vmatmul.f32.gmra.mxu2 %v156_v23  ;;  %293 = vmatmul.f32.gmra.mxu0 %v156_v23 }
  0xa7   :  { %270 = vmatmul.f32.gmra.mxu3 %v157_v24  ;;  %316 = vmatmul.f32.gmra.mxu1 %v157_v24 }
 0x11b   :  { %v291_v26 = vpop.f32.mrf.mxu0 }
 0x11c   :  { %v314_v28 = vpop.f32.mrf.mxu1  ;;  %v292_v29 = vadd.f32 %v291_v26, %v225_v27 }
 0x11e   :  { %v315_v34 = vadd.f32 %v314_v28, %v292_v29 }
 0x120   :  { %v321_v39 = vmax.f32 %v315_v34, 0.0 }
 0x121   :  { %v245_v30 = vpop.f32.mrf.mxu2 }
 0x122   :  { %v268_v32 = vpop.f32.mrf.mxu3  ;;  %v246_v37 = vadd.f32 %v245_v30, %v224_v31 }
 0x123   :  { %v294_v33 = vpop.f32.mrf.mxu0 }
 0x124   :  { %v295_v35 = vadd.f32 %v294_v33, %v225_v27  ;;  %v317_v36 = vpop.f32.mrf.mxu1  ;;  %v269_v42 = vadd.f32 %v268_v32, %v246_v37 }
 0x126   :  { %v318_v38 = vadd.f32 %v317_v36, %v295_v35  ;;  %v320_v48 = vmax.f32 %v269_v42, 0.0 }
 0x128   :  { %v323_v40 = vmax.f32 %v318_v38, 0.0 }
 0x129   :  { %v248_v41 = vpop.f32.mrf.mxu2 }
 0x12a   :  { %v331_v43 = vadd.f32 %v323_v40, %v321_v39  ;;  %v249_v44 = vadd.f32 %v248_v41, %v224_v31  ;;  %v271_v45 = vpop.f32.mrf.mxu3 }
 0x12c   :  { %v332_v46 = vrot.slane %v331_v43, 4  ;;  %v272_v47 = vadd.f32 %v271_v45, %v249_v44 }
 0x12e   :  { %v333_v49 = vadd.f32 %v332_v46, %v331_v43  ;;  %v322_v50 = vmax.f32 %v272_v47, 0.0 }
 0x130   :  { %v334_v51 = vrot.slane %v333_v49, 2  ;;  %v324_v52 = vadd.f32 %v322_v50, %v320_v48 }
 0x132   :  { %v325_v53 = vrot.slane %v324_v52, 4  ;;  %v335_v54 = vadd.f32 %v334_v51, %v333_v49 }
 0x134   :  { %v326_v55 = vadd.f32 %v325_v53, %v324_v52  ;;  %v336_v56 = vrot.slane %v335_v54, 1 }
 0x136   :  { %v327_v58 = vrot.slane %v326_v55, 2  ;;  %v337_v60 = vadd.f32 %v336_v56, %v335_v54 }
 0x138   :  { %v328_v59 = vadd.f32 %v327_v58, %v326_v55  ;;  %v345_v1 = vmul.f32 %v341_v61, %v337_v60 }
 0x13a   :  { %v329_v62 = vrot.slane %v328_v59, 1  ;;  %v348_v4 = vsel %vm346_vm1, %v345_v1, 0.0 }
 0x13c   :  { %v330_v0 = vadd.f32 %v329_v62, %v328_v59 }
 0x13e   :  { %v344_v2 = vmul.f32 %v340_v63, %v330_v0 }
 0x140   :  { %v347_v3 = vsel %vm346_vm1, %v344_v2, 0.0 }
 0x141   :  { %v349_v5 = vadd.f32 %v348_v4, %v347_v3 }
 0x143   :  { %350 = vadd.xlane.f32.xlu0 %v349_v5 }
 0x1b6   :  { %v351_v6 = vpop.xlane.xlu0 %350 }
 0x1b7   :  { %352 = vst [vmem:[#allocation10] sm:$0x1] %v351_v6 }
 0x1b8   :  { %363 = dma.vmem_to_hbm [thread:$0]  %s359_s21, 16, %s361_s5, [#allocation4]  }
 0x1b9   :  { %511 = dma.done.wait [#allocation4], 16  }
 0x1ba   :  { %512 = vsyncadd [#allocation4], 4294967280 }
 0x1bb   :  { %368 = vsyncpa [#allocation3], 1 }
 0x1bc   :  { %369 = vsyncpa [#allocation6], 1 }
 0x1bd   :  { %370 = vsyncpa [#allocation9], 1 }
 0x1be   :  { %371 = vsyncpa [#allocation4], 1 }

</bundles_post_ra>
